<compile_context>
chip_gen: v6e
topology: v6e:2x2x1
jax: 0.10.0
libtpu: 0.0.40
codegen_flags: <defaults>
</compile_context>

<pallas_src>
import jax
import jax.numpy as jnp
from jax.experimental import pallas as pl
from jax.experimental.pallas import tpu as pltpu


def _round_up(x, m):
    return ((x + m - 1) // m) * m


# ----------------------------- kernels --------------------------------------

def _conv1x1_fused_kernel(w_ref, x_ref, b_ref, r_ref, o_ref):
    # (TCO, Cin) @ (Cin, TS) on the MXU, f32 accumulation.
    acc = jnp.dot(w_ref[...], x_ref[...], preferred_element_type=jnp.float32)
    # f32 epilogue on the VPU: bias + residual + relu.
    acc = acc + b_ref[...].astype(jnp.float32)           # (TCO, 1) broadcast
    acc = acc + r_ref[...].astype(jnp.float32)           # residual x2
    o_ref[...] = jnp.maximum(acc, 0.0).astype(o_ref.dtype)


def _add_relu_kernel(a_ref, b_ref, o_ref):
    s = a_ref[...].astype(jnp.float32) + b_ref[...].astype(jnp.float32)
    o_ref[...] = jnp.maximum(s, 0.0).astype(o_ref.dtype)


# ----------------------------- wrappers -------------------------------------

def _conv1x1_add_relu(x1, x2, weight, bias, stride, padding, compute_dtype):
    """relu(Conv2d(k=1, stride, padding)(x1) + x2).  x1/x2 NCHW; no transposes."""
    N, Cin, H, W = x1.shape
    w2 = jnp.reshape(weight, (weight.shape[0], -1))       # accept (Cout,Cin[,1,1])
    Cout = w2.shape[0]
    assert w2.shape == (Cout, Cin), (w2.shape, (Cout, Cin))
    Ho = (H + 2 * padding - 1) // stride + 1
    Wo = (W + 2 * padding - 1) // stride + 1
    Msp = Ho * Wo
    assert x2.shape == (N, Cout, Ho, Wo), (x2.shape, (N, Cout, Ho, Wo))

    # Single fused XLA prep pass over x1: spatial zero-pad + stride slice
    # (+ tiny channel pad to a sublane multiple) + bf16 cast.  Channels stay
    # on sublanes, spatial lands on lanes -> no layout transposes anywhere.
    Cin_p = _round_up(Cin, 8)
    xp = x1
    if padding:
        xp = jnp.pad(xp, ((0, 0), (0, 0), (padding, padding), (padding, padding)))
    xp = xp[:, :, ::stride, ::stride]                     # (N, Cin, Ho, Wo)
    if Cin_p != Cin:
        xp = jnp.pad(xp, ((0, 0), (0, Cin_p - Cin), (0, 0), (0, 0)))
    x_k = xp.reshape(N, Cin_p, Msp).astype(compute_dtype)

    if Cin_p != Cin:
        w2 = jnp.pad(w2, ((0, 0), (0, Cin_p - Cin)))      # zeros: exact result
    w_k = w2.astype(compute_dtype)                        # (Cout, Cin_p)
    b_k = bias.reshape(Cout, 1)                           # (Cout, 1)
    r_k = x2.reshape(N, Cout, Msp)                        # free reshape
    out_dtype = x1.dtype

    # Tiles: Cout tile on sublanes (mult of 8), spatial tile on lanes (mult of 128).
    TCO = min(_round_up(Cout, 8), 512)
    TS = min(_round_up(Msp, 128), 512)
    grid = (pl.cdiv(Cout, TCO), N, pl.cdiv(Msp, TS))

    cb = jnp.dtype(compute_dtype).itemsize
    block_bytes = (TCO * Cin_p * cb                       # weight tile
                   + Cin_p * TS * cb                      # activation tile
                   + TCO * b_k.dtype.itemsize             # bias tile
                   + TCO * TS * r_k.dtype.itemsize        # residual tile
                   + TCO * TS * jnp.dtype(out_dtype).itemsize)
    vmem_limit = int(max(2 * block_bytes + (8 << 20), 32 << 20))

    bytes_accessed = int(x_k.size * cb + w_k.size * cb
                         + b_k.size * b_k.dtype.itemsize
                         + r_k.size * r_k.dtype.itemsize
                         + N * Cout * Msp * jnp.dtype(out_dtype).itemsize)

    out = pl.pallas_call(
        _conv1x1_fused_kernel,
        out_shape=jax.ShapeDtypeStruct((N, Cout, Msp), out_dtype),
        grid_spec=pl.GridSpec(
            grid=grid,
            in_specs=[
                # weight: constant block index over (n, i) -> grid-resident
                pl.BlockSpec((TCO, Cin_p), lambda j, n, i: (j, 0)),
                # x1 activations (ragged spatial edge handled by Pallas)
                pl.BlockSpec((None, Cin_p, TS), lambda j, n, i: (n, 0, i)),
                # bias: resident like the weights
                pl.BlockSpec((TCO, 1), lambda j, n, i: (j, 0)),
                # residual x2, native channel-major layout
                pl.BlockSpec((None, TCO, TS), lambda j, n, i: (n, j, i)),
            ],
            out_specs=pl.BlockSpec((None, TCO, TS), lambda j, n, i: (n, j, i)),
        ),
        compiler_params=pltpu.CompilerParams(
            dimension_semantics=("parallel", "parallel", "parallel"),
            vmem_limit_bytes=vmem_limit,
        ),
        cost_estimate=pl.CostEstimate(
            flops=2 * N * Msp * Cin_p * Cout,
            transcendentals=0,
            bytes_accessed=bytes_accessed,
        ),
    )(w_k, x_k, b_k, r_k)

    return out.reshape(N, Cout, Ho, Wo)                   # free reshape, NCHW


def _add_relu(x1, x2):
    """relu(x1 + x2), elementwise (stride == 1 path)."""
    assert x1.shape == x2.shape
    shape, dtype = x1.shape, x1.dtype
    total = x1.size
    itemsize = jnp.dtype(dtype).itemsize

    lanes = None
    for cand in (1024, 512, 256, 128):
        if total % cand == 0:
            lanes = cand
            break
    if lanes is None:
        # Rare ragged case: pad only the <128-element tail.
        lanes = 128
        rows = pl.cdiv(total, lanes)
        pad = rows * lanes - total
        a = jnp.pad(x1.reshape(-1), (0, pad)).reshape(rows, lanes)
        b = jnp.pad(x2.reshape(-1), (0, pad)).reshape(rows, lanes)
        padded = True
    else:
        rows = total // lanes
        a = x1.reshape(rows, lanes)                       # free reshape
        b = x2.reshape(rows, lanes)
        padded = False

    # ~2 MiB blocks; keep >= 2 grid steps when possible (v7x dual TensorCore).
    target_rows = max(8, ((2 << 20) // (lanes * itemsize)) // 8 * 8)
    half_rows = max(8, _round_up(pl.cdiv(rows, 2), 8))
    br = min(_round_up(rows, 8), target_rows, half_rows)

    out = pl.pallas_call(
        _add_relu_kernel,
        out_shape=jax.ShapeDtypeStruct((rows, lanes), dtype),
        grid_spec=pl.GridSpec(
            grid=(pl.cdiv(rows, br),),
            in_specs=[pl.BlockSpec((br, lanes), lambda i: (i, 0)),
                      pl.BlockSpec((br, lanes), lambda i: (i, 0))],
            out_specs=pl.BlockSpec((br, lanes), lambda i: (i, 0)),
        ),
        compiler_params=pltpu.CompilerParams(
            dimension_semantics=("parallel",)),
    )(a, b)

    if padded:
        return out.reshape(-1)[:total].reshape(shape)
    return out.reshape(shape)


def residual_block_forward(x1, x2, weight, bias, *, stride, padding=1,
                           compute_dtype=jnp.bfloat16):
    """ResidualBlock.forward: relu(conv1x1(x1) + x2) if stride != 1 else relu(x1 + x2).

    x1, x2 are NCHW; weight is (Cout, Cin) or (Cout, Cin, 1, 1); bias is (Cout,).
    compute_dtype controls the MXU operand dtype (accumulation stays f32).
    """
    # TODO(synk): nn.ReLU(inplace=True) aliasing (input_output_aliases) is not
    # applied since the caller may still need x1/x2.
    if stride != 1:
        return _conv1x1_add_relu(x1, x2, weight, bias, stride, padding,
                                 compute_dtype)
    return _add_relu(x1, x2)


# ----------------------------- main -----------------------------------------

if __name__ == "__main__":
    key = jax.random.PRNGKey(0)
    k1, k2, k3, k4, k5 = jax.random.split(key, 5)

    N, Cin, Cout, H, W = 2, 4, 8, 16, 16
    stride, padding = 2, 1
    Ho = (H + 2 * padding - 1) // stride + 1
    Wo = (W + 2 * padding - 1) // stride + 1              # 9 x 9

    x1 = jax.random.normal(k1, (N, Cin, H, W), jnp.float32)
    x2 = jax.random.normal(k2, (N, Cout, Ho, Wo), jnp.float32)
    weight = jax.random.normal(k3, (Cout, Cin), jnp.float32) * 0.1
    bias = jax.random.normal(k4, (Cout,), jnp.float32) * 0.1

    # stride != 1 path (fused conv1x1 + bias + residual + relu kernel)
    out = residual_block_forward(x1, x2, weight, bias,
                                 stride=stride, padding=padding)
    out = jax.block_until_ready(out)

    # pure-JAX reference
    ref_conv = jax.lax.conv_general_dilated(
        x1, weight[:, :, None, None], (stride, stride),
        [(padding, padding), (padding, padding)],
        dimension_numbers=("NCHW", "OIHW", "NCHW"),
        precision=jax.lax.Precision.HIGHEST)
    ref = jnp.maximum(ref_conv + bias[None, :, None, None] + x2, 0.0)
    assert out.shape == ref.shape, (out.shape, ref.shape)
    err = float(jnp.max(jnp.abs(out - ref)))
    if err > 2e-2:
        raise SystemExit(f"mismatch (stride!=1 path): max abs err {err}")

    # stride == 1 path (elementwise relu(x1 + x2) kernel)
    x1b = jax.random.normal(k5, (N, Cout, Ho, Wo), jnp.float32)
    out1 = residual_block_forward(x1b, x2, weight, bias,
                                  stride=1, padding=padding)
    out1 = jax.block_until_ready(out1)
    ref1 = jnp.maximum(x1b + x2, 0.0)
    err1 = float(jnp.max(jnp.abs(out1 - ref1)))
    if err1 > 1e-5:
        raise SystemExit(f"mismatch (stride==1 path): max abs err {err1}")

    print("KERNEL_OK")
</pallas_src>

<mosaic_0001>
module attributes {stable_mosaic.version = 11 : i64} {
  func.func @_conv1x1_fused_kernel(%arg0: i32, %arg1: i32, %arg2: i32, %arg3: memref<8x8xbf16, #tpu.memory_space<vmem>>, %arg4: memref<1x8x128xbf16, #tpu.memory_space<vmem>>, %arg5: memref<8x1xf32, #tpu.memory_space<vmem>>, %arg6: memref<1x8x128xf32, #tpu.memory_space<vmem>>, %arg7: memref<1x8x128xf32, #tpu.memory_space<vmem>>) attributes {dimension_semantics = [#tpu.dimension_semantics<parallel>, #tpu.dimension_semantics<parallel>, #tpu.dimension_semantics<parallel>], iteration_bounds = array<i64: 1, 2, 1>, scalar_prefetch = 0 : i64, scratch_operands = 0 : i64, tpu.core_type = #tpu.core_type<tc>, window_params = [{transform_indices = @transform_0, window_bounds = array<i64: 8, 8>}, {transform_indices = @transform_1, window_bounds = array<i64: 1, 8, 128>}, {transform_indices = @transform_2, window_bounds = array<i64: 8, 1>}, {transform_indices = @transform_3, window_bounds = array<i64: 1, 8, 128>}, {transform_indices = @transform_4, window_bounds = array<i64: 1, 8, 128>}]} {
    %c0 = arith.constant 0 : index
    %c0_0 = arith.constant 0 : index
    %0 = vector.load %arg3[%c0, %c0_0] : memref<8x8xbf16, #tpu.memory_space<vmem>>, vector<8x8xbf16>
    %c0_1 = arith.constant 0 : index
    %c0_2 = arith.constant 0 : index
    %c0_3 = arith.constant 0 : index
    %1 = vector.load %arg4[%c0_1, %c0_2, %c0_3] : memref<1x8x128xbf16, #tpu.memory_space<vmem>>, vector<1x8x128xbf16>
    %2 = vector.shape_cast %1 : vector<1x8x128xbf16> to vector<8x128xbf16>
    %cst = arith.constant dense<0.000000e+00> : vector<8x128xf32>
    %3 = tpu.matmul %0, %2, %cst {dimension_numbers = #tpu.dot_dimension_numbers<[1], [0], [0], [1], [0, 0, 1, 1], [], []>} : vector<8x8xbf16>, vector<8x128xbf16>, vector<8x128xf32> -> vector<8x128xf32>
    %c0_4 = arith.constant 0 : index
    %c0_5 = arith.constant 0 : index
    %4 = vector.load %arg5[%c0_4, %c0_5] : memref<8x1xf32, #tpu.memory_space<vmem>>, vector<8x1xf32>
    %5 = vector.broadcast %4 : vector<8x1xf32> to vector<8x128xf32>
    %6 = arith.addf %3, %5 : vector<8x128xf32>
    %c0_6 = arith.constant 0 : index
    %c0_7 = arith.constant 0 : index
    %c0_8 = arith.constant 0 : index
    %7 = vector.load %arg6[%c0_6, %c0_7, %c0_8] : memref<1x8x128xf32, #tpu.memory_space<vmem>>, vector<1x8x128xf32>
    %8 = vector.shape_cast %7 : vector<1x8x128xf32> to vector<8x128xf32>
    %9 = arith.addf %6, %8 : vector<8x128xf32>
    %cst_9 = arith.constant 0.000000e+00 : f32
    %10 = vector.broadcast %cst_9 : f32 to vector<8x128xf32>
    %11 = arith.maximumf %9, %10 : vector<8x128xf32>
    %c0_10 = arith.constant 0 : index
    %c0_11 = arith.constant 0 : index
    %c0_12 = arith.constant 0 : index
    %12 = vector.load %arg7[%c0_10, %c0_11, %c0_12] : memref<1x8x128xf32, #tpu.memory_space<vmem>>, vector<1x8x128xf32>
    %13 = vector.shape_cast %12 : vector<1x8x128xf32> to vector<8x128xf32>
    %14 = vector.shape_cast %11 : vector<8x128xf32> to vector<1x8x128xf32>
    tpu.vector_store %arg7[%c0_10, %c0_11, %c0_12], %14 {strides = array<i32>} : memref<1x8x128xf32, #tpu.memory_space<vmem>>, vector<1x8x128xf32>,
    return
  }
  func.func @transform_0(%arg0: i32, %arg1: i32, %arg2: i32) -> (i32, i32) {
    %c0_i32 = arith.constant 0 : i32
    %c0_i32_0 = arith.constant 0 : i32
    return %arg0, %c0_i32 : i32, i32
  }
  func.func @transform_1(%arg0: i32, %arg1: i32, %arg2: i32) -> (i32, i32, i32) {
    %c0_i32 = arith.constant 0 : i32
    %c0_i32_0 = arith.constant 0 : i32
    return %arg1, %c0_i32, %arg2 : i32, i32, i32
  }
  func.func @transform_2(%arg0: i32, %arg1: i32, %arg2: i32) -> (i32, i32) {
    %c0_i32 = arith.constant 0 : i32
    %c0_i32_0 = arith.constant 0 : i32
    return %arg0, %c0_i32 : i32, i32
  }
  func.func @transform_3(%arg0: i32, %arg1: i32, %arg2: i32) -> (i32, i32, i32) {
    %c0_i32 = arith.constant 0 : i32
    return %arg1, %arg0, %arg2 : i32, i32, i32
  }
  func.func @transform_4(%arg0: i32, %arg1: i32, %arg2: i32) -> (i32, i32, i32) {
    %c0_i32 = arith.constant 0 : i32
    return %arg1, %arg0, %arg2 : i32, i32, i32
  }
}

</mosaic_0001>

<bundles_post_ra>
// kernel: tpu_custom_call.1
= control target key start
LH: loop header
LB: loop body
LE: loop exit
PB: predicated region body
PF: predicated region fallthrough
CT: control target
= control target key end

     0   :  { %9 = vsyncpa [#allocation3], 0  ;;  %s966_s0 = inlined_call_operand.hbm [shape: bf16[8,8], index: 0, kind: input, shape index: {}]   ;;  %s967_s1 = inlined_call_operand.vmem [shape: bf16[2,8,81], index: 1, kind: input, shape index: {}]   ;;  %s968_s2 = inlined_call_operand.vmem [shape: f32[8,1], index: 2, kind: input, shape index: {}]   ;;  %s969_s3 = inlined_call_operand.hbm [shape: f32[2,8,81], index: 3, kind: input, shape index: {}]   ;;  %s970_s4 = inlined_call_operand.hbm [shape: f32[2,8,81], index: 4, kind: output, shape index: {}]  }
   0x1   :  { %10 = vsyncpa [#allocation6], 0 }
   0x2   :  { %12 = vsyncpa [#allocation6 + $0x1], 0 }
   0x3   :  { %13 = vsyncpa [#allocation4], 0 }
   0x4   :  { %15 = vsyncpa [#allocation4 + $0x1], 0  ;;  %s787_s15 = smov 0   ;;  %s789_s16 = smov 0  }
   0x5   :  { %s791_s17 = smov 0   ;;  %s793_s18 = smov 0  }
   0x6   :  { %s795_s19 = smov 0   ;;  %s797_s20 = smov 0  }
   0x7 LB: > { %s513_s21 = sadd.s32 4294967295, %s754_s20   ;;  %s514_s22 = sadd.s32 4294967294, %s754_s20   ;;  %s754_s20 = sphi %s797_s20, %s21_s20   ;;  %s750_s19 = sphi %s795_s19, %s987_s19   ;;  %s746_s18 = sphi %s793_s18, %s986_s18   ;;  %s742_s17 = sphi %s791_s17, %s985_s17   ;;  %s738_s16 = sphi %s789_s16, %s984_s16   ;;  %s734_s15 = sphi %s787_s15, %s983_s15  }
   0x8   : > { %p144_p0 = scmp.ne.s32.totalorder %s738_s16, %s734_s15  ;;  %p821_p1 = scmp.eq.s32.totalorder %s513_s21, 0 }
   0x9   : > { %p825_p2 = scmp.eq.s32.totalorder %s513_s21, 1  ;;  %p178_p3 = scmp.eq.s32.totalorder %s514_s22, 1 }
   0xa   : > { %p831_p4 = por %p821_p1, %p144_p0  ;;  %p515_p5 = scmp.ge.s32.totalorder %s754_s20, 1 }
   0xb   : > { %p836_p6 = por %p178_p3, %p144_p0  ;;  %p185_p7 = scmp.lt.s32.totalorder %s754_s20, 3 }
   0xc   : > { %s974_s25 = scalar_select %p831_p4, 1, 0 }
   0xd   : > { %s975_s26 = scalar_select %p836_p6, 1, 0 }
   0xe   : > { %p841_p8 = pnand %p515_p5, %p185_p7  ;;  %s756_s28 = smov [#allocation2]  }
   0xf   : > { %s200_s29 = sshll.u32 %s756_s28, 4  ;;  %s36_s5 = sadd.s32 1, %s750_s19  ;;  %s201_s29 = int_to_ptr.vmem [resolvable:$true] %s200_s29 }
  0x10   : > { %p547_p10 = pneg %p841_p8  ;;  %s131_s6 = sadd.s32 1, %s742_s17 }
  0x11   : > { %p38_p12 = scmp.ge.s32.totalorder %s36_s5, 2  ;;  %s627_s7 = scalar_lea.vmem %s201_s29, 64 }
  0x12   : > { %p850_p11 = pnand %p547_p10, %p821_p1  ;;  %p628_p0 = scmp.ne.s32.totalorder %s201_s29, %s627_s7 }
  0x13   : > { %p635_p7 = scmp.lt.s32.totalorder %s201_s29, %s201_s29  ;;  %p636_p6 = scmp.lt.s32.totalorder %s627_s7, %s627_s7 }
  0x14   : > { %p618_p13 = pneg %p850_p11 }
  0x15   : > { %p637_p9 = por %p636_p6, %p635_p7 }
  0x16   : > { %p630_p3 = pnand %p628_p0, %p618_p13 }
  0x18   : > { %p631_p5 = pneg %p630_p3 }
  0x1a   : > { %p638_p4 = pnand %p637_p9, %p631_p5 }
  0x1c   : > { %641 = shalt.err (!%p638_p4)
}
  0x1d   : > { %550 = dma.hbm_to_vmem [thread:$0]  (!%p850_p11), %s966_s0, 64, %s201_s29, [#allocation3]  }
  0x1e   : > { %s989_s5 = smov (%p38_p12, %s36_s5), 0  ;;  %p138_p6 = scmp.ne.s32.totalorder %s742_s17, %s738_s16 }
  0x1f   : > { %p139_p4 = scmp.eq.s32.totalorder %s754_s20, 0  ;;  %s124_s10 = ssub.s32 %s750_s19, %s989_s5 }
  0x20   : > { %p560_p9 = scmp.lt.s32.totalorder %s754_s20, 2  ;;  %p129_p10 = scmp.eq.s32.totalorder %s124_s10, 0 }
  0x21   : > { %p140_p13 = por %p139_p4, %p138_p6  ;;  %p873_p0 = por %p825_p2, %p138_p6 }
  0x22   : > { %s228_s12 = sand.u32 1, %s742_s17   ;;  %s520_s21 = sshll.u32 %s750_s19, 7 }
  0x23   : > { %s879_s13 = scalar_select %p129_p10, %s742_s17, %s131_s6  }
  0x24   : > { %s519_s14 = sshll.u32 %s228_s12, 3  ;;  %s239_s29 = scalar_lea.hbm %s969_s3, %s520_s21 }
  0x25   : > { %s232_s30 = scalar_lea.vmem [#allocation5], %s519_s14  ;;  %p885_p11 = pnand %p560_p9, %p140_p13 }
  0x26   : > { %s241_s7 = sshll.u32 %s232_s30, 4  ;;  %s229_s24 = scalar_lea.sflag [#allocation6], %s228_s12  ;;  %s242_s7 = int_to_ptr.vmem [resolvable:$true] %s241_s7 }
  0x27   : > { %p644_p2 = pneg %p885_p11  ;;  %s655_s9 = scalar_lea.vmem %s242_s7, 128 }
  0x28   : > { %p656_p12 = scmp.ne.s32.totalorder %s242_s7, %s655_s9  ;;  %s757_s6 = smov [#allocation5]  }
  0x29   : > { %s660_s10 = sshll.u32 %s757_s6, 4  ;;  %s661_s10 = int_to_ptr.vmem [resolvable:$false] %s660_s10 }
  0x2a   : > { %p658_p3 = pnand %p656_p12, %p644_p2  ;;  %s662_s22 = scalar_lea.vmem %s661_s10, 256 }
  0x2b   : > { %p663_p7 = scmp.lt.s32.totalorder %s242_s7, %s661_s10  ;;  %p664_p6 = scmp.lt.s32.totalorder %s662_s22, %s655_s9 }
  0x2c   : > { %p659_p5 = pneg %p658_p3 }
  0x2d   : > { %p665_p4 = por %p664_p6, %p663_p7 }
  0x2f   : > { %p666_p10 = pnand %p665_p4, %p659_p5 }
  0x31   : > { %669 = shalt.err (!%p666_p10)
}
  0x32   : > { %554 = dma.hbm_to_vmem [thread:$0]  (!%p885_p11), %s239_s29, 128, %s242_s7, %s229_s24  }
  0x33   : > { %250 = sbr.rel (%p841_p8) target bundleno = 284 (0x11c), region = 36 }
  0x38   : > { %721 = dma.done.wait (%p821_p1), [#allocation3], 64  }
  0x39   : > { %723 = vsyncadd (%p821_p1), [#allocation3], 4294967232  ;;  %s900_s12 = sand.u32 1, %s738_s16   ;;  %p980_p9 = scmp.ne.s32.totalorder %s974_s25, 0 }
  0x3a   : > { %s523_s14 = sshll.u32 %s900_s12, 3  ;;  %s257_s21 = scalar_lea.sflag [#allocation6], %s900_s12 }
  0x3b   : > { %s260_s28 = scalar_lea.vmem [#allocation5], %s523_s14 }
  0x3c   : > { %725 = dma.done.wait (%p980_p9), %s257_s21, 128  }
  0x3d   : > { %727 = vsyncadd (%p980_p9), %s257_s21, 4294967168  ;;  %p296_p8 = scmp.lt.s32.totalorder %s746_s18, 1  ;;  %v758_v0 = vmov 0.0   ;;  %vm759_vm0 = vmmov 0   ;;  %v760_v1 = vmov 0   ;;  %vm320_vm1 = vcmask 1043456  }
  0x3e   : > { %533 = vmatprep.subr.bf16.mxu0 %v758_v0  ;;  %535 = vmatprep.mubr.msk.bf16.mxu0 %vm759_vm0, %v758_v0  ;;  %v310_v3 = vld [vmem:[%s968_s2] sm:$0xff]  ;;  %vm316_vm2 = vcmask 64512   ;;  %s528_s24 = sshll.u32 %s746_s18, 7  ;;  %s295_s9 = scalar_lea.vmem [#allocation7], %s523_s14 }
  0x3f   : > { %s297_s23 = scalar_select %p296_p8, %s746_s18, 1  ;;  %615 = vset.pattern.permute.xlu0 %v760_v1  ;;  %v308_v5 = vld [vmem:[#allocation2] sm:$0xf]  ;;  %v364_v8 = vld [vmem:[%s260_s28] sm:$0xff] }
  0x40   : > { %313 = vperm.xlu0 %615, %v310_v3   ;;  %s384_s6 = sshll.u32 %s295_s9, 4  ;;  %s924_s21 = scalar_lea.hbm %s970_s4, %s528_s24  ;;  %s385_s6 = int_to_ptr.vmem [resolvable:$true] %s384_s6 }
  0x41   : > { %s525_s27 = sshll.u32 %s297_s23, 2  ;;  %s369_s23 = scalar_lea.sflag [#allocation4], %s900_s12 }
  0x42   : > { %s302_s7 = scalar_lea.vmem %s967_s1, %s525_s27  ;;  %s670_s28 = scalar_lea.vmem %s385_s6, 128 }
  0x43   : > { %v309_v2 = vld [vmem:[%s302_s7] sm:$0xf]  ;;  %p671_p1 = scmp.ne.s32.totalorder %s385_s6, %s670_s28  ;;  %s761_s18 = smov [#allocation7]  }
  0x44   : > { %v322_v4 = vsel %vm320_vm1, %v309_v2, 0  ;;  %s674_s14 = sshll.u32 %s761_s18, 4  ;;  %s675_s14 = int_to_ptr.vmem [resolvable:$false] %s674_s14 }
  0x45   : > { %534 = vmatpush3.bf16.msra.mxu0 %v322_v4  ;;  %p672_p13 = pnand %p671_p1, %p873_p0  ;;  %s676_s27 = scalar_lea.vmem %s675_s14, 256 }
  0x46   : > { %p677_p2 = scmp.lt.s32.totalorder %s385_s6, %s675_s14  ;;  %p678_p12 = scmp.lt.s32.totalorder %s676_s27, %s670_s28 }
  0x47   : > { %p673_p11 = pneg %p672_p13 }
  0x48   : > { %536 = vmatmul.mubr.msk.bf16.vlgmr.msra.gmra.mxu0 %vm316_vm2, %v308_v5  ;;  %p679_p3 = por %p678_p12, %p677_p2 }
  0x4a   : > { %p680_p5 = pnand %p679_p3, %p673_p11 }
  0xbb   : > { %v314_v6 = vpop.permute.xlu0 %313 }
 0x108   : > { %v358_v7 = vpop.f32.mrf.mxu0 }
 0x109   : > { %v359_v9 = vadd.f32 %v358_v7, %v314_v6 }
 0x10a   : > { %v537_v10 = vpop.f32.mrf.mxu0 }
 0x10b   : > { %v365_v11 = vadd.f32 %v364_v8, %v359_v9 }
 0x10c   : > { %v361_v12 = vpop.f32.mrf.mxu0 }
 0x10d   : > { %v366_v13 = vmax.f32 %v365_v11, 0.0 }
 0x10e   : > { %v538_v14 = vpop.f32.mrf.mxu0 }
 0x10f   : > { %367 = vst [vmem:[%s295_s9] sm:$0xff] %v366_v13 }
 0x110   : > { %683 = shalt.err (!%p680_p5)
}
 0x111   : > { %s684_s29 = scalar_lea.hbm %s924_s21, 128  ;;  %s688_s7 = scalar_lea.hbm %s970_s4, 256 }
 0x112   : > { %p685_p7 = scmp.ne.s32.totalorder %s924_s21, %s684_s29  ;;  %p689_p10 = scmp.lt.s32.totalorder %s924_s21, %s970_s4 }
 0x113   : > { %p690_p9 = scmp.lt.s32.totalorder %s688_s7, %s684_s29 }
 0x114   : > { %p686_p6 = pnand %p685_p7, %p873_p0 }
 0x115   : > { %p691_p8 = por %p690_p9, %p689_p10 }
 0x116   : > { %p687_p4 = pneg %p686_p6 }
 0x118   : > { %p692_p1 = pnand %p691_p8, %p687_p4 }
 0x11a   : > { %695 = shalt.err (!%p692_p1)
}
 0x11b   : > { %545 = dma.vmem_to_hbm [thread:$0]  (%p873_p0), %s385_s6, 128, %s924_s21, %s369_s23  }
 0x11c PF: > { %s396_s24 = sand.u32 1, %s734_s15   ;;  %p981_p13 = scmp.ne.s32.totalorder %s975_s26, 0 }
 0x11d   : > { %p982_p11 = scmp.ge.s32.totalorder %s754_s20, 2  ;;  %s397_s9 = scalar_lea.sflag [#allocation4], %s396_s24 }
 0x11f   : > { %p556_p2 = pnand %p982_p11, %p981_p13 }
 0x121   : > { %p557_p12 = pneg %p556_p2 }
 0x123   : > { %729 = dma.done.wait (%p557_p12), %s397_s9, 128  }
 0x124   : > { %731 = vsyncadd (%p557_p12), %s397_s9, 4294967168  ;;  %s21_s20 = sadd.s32 1, %s754_s20   ;;  %s983_s15 = smov %s738_s16 }
 0x125   : > { %p18_p3 = scmp.ge.s32.totalorder %s21_s20, 4   ;;  %s984_s16 = smov %s742_s17 }
 0x126   : > { %s985_s17 = smov %s879_s13  ;;  %s986_s18 = smov %s750_s19 }
 0x127   : > { %s987_s19 = smov %s989_s5  ;;  %20 = sbr.rel (!%p18_p3) target bundleno = 7 (0x7), region = 93 }
 0x12c   :  { %402 = vsyncpa [#allocation3], 1 }
 0x12d   :  { %404 = vsyncpa [#allocation3 + $0x1], 1 }
 0x12e   :  { %405 = vsyncpa [#allocation6], 1 }
 0x12f   :  { %407 = vsyncpa [#allocation6 + $0x1], 1 }
 0x130   :  { %408 = vsyncpa [#allocation4], 1 }
 0x131   :  { %410 = vsyncpa [#allocation4 + $0x1], 1 }

</bundles_post_ra>
